<compile_context>
chip_gen: v7x
topology: tpu7x:2x2x1
jax: 0.10.0
libtpu: 0.0.40
codegen_flags: <defaults>
</compile_context>

<pallas_src>
import math

import jax
import jax.numpy as jnp
from jax.experimental import pallas as pl
from jax.experimental.pallas import tpu as pltpu

_LANES = 128
_SUBLANES = 8
_TARGET_BLOCK_BYTES = 2 * 1024 * 1024  # ~2 MiB per block per array


def _copy_kernel(x_ref, o_ref):
    # Elementwise identity: copy the current VMEM tile through.
    o_ref[...] = x_ref[...]


def identity_map(x, *args, donate=True, **kwargs):
    """Pallas implementation of IdentityMap.forward(x, *args, **kwargs) -> x."""
    del args, kwargs  # ignored, matching the PyTorch module
    orig_shape = x.shape
    total = math.prod(orig_shape) if orig_shape else 1

    if total == 0:
        return x  # nothing to copy

    if total % _LANES != 0:
        # TODO(synk): ragged (non-128-divisible) sizes fall back to a single
        # whole-array VMEM copy; fine for small tensors, not VMEM-budgeted for
        # huge ragged ones.
        return pl.pallas_call(
            _copy_kernel,
            out_shape=jax.ShapeDtypeStruct(x.shape, x.dtype),
            input_output_aliases={0: 0} if donate else {},
        )(x)

    # Lane-dense path: view the tensor as (rows, 128).
    rows = total // _LANES
    x2 = x.reshape(rows, _LANES)

    itemsize = jnp.dtype(x.dtype).itemsize
    block_rows = max(_SUBLANES, _TARGET_BLOCK_BYTES // (_LANES * itemsize))
    block_rows = (block_rows // _SUBLANES) * _SUBLANES  # keep (8,128)-aligned
    if block_rows >= rows:
        block_rows = rows  # single block == full array (always a legal block)
    grid = (pl.cdiv(rows, block_rows),)

    out2 = pl.pallas_call(
        _copy_kernel,
        out_shape=jax.ShapeDtypeStruct((rows, _LANES), x.dtype),
        grid=grid,
        in_specs=[pl.BlockSpec((block_rows, _LANES), lambda i: (i, 0))],
        out_specs=pl.BlockSpec((block_rows, _LANES), lambda i: (i, 0)),
        input_output_aliases={0: 0} if donate else {},
        compiler_params=pltpu.CompilerParams(
            dimension_semantics=("parallel",),  # shards row-blocks over v7x TCs
        ),
    )(x2)
    return out2.reshape(orig_shape)


if __name__ == "__main__":
    key = jax.random.PRNGKey(0)
    # Small shapes consistent with a projector input: batch=2, seq=8, hidden=32.
    x = jax.random.normal(key, (2, 8, 32), dtype=jnp.float32)
    x_host = jax.device_get(x)  # snapshot for the check (kernel aliases its input)

    y = jax.jit(identity_map)(x)
    jax.block_until_ready(y)

    assert y.shape == x_host.shape and y.dtype == x_host.dtype
    assert (jax.device_get(y) == x_host).all()

    print("KERNEL_OK")
</pallas_src>

<mosaic_0001>
module attributes {stable_mosaic.version = 11 : i64} {
  func.func @_copy_kernel(%arg0: i32, %arg1: memref<4x128xf32, #tpu.memory_space<vmem>>, %arg2: memref<4x128xf32, #tpu.memory_space<vmem>>) attributes {dimension_semantics = [#tpu.dimension_semantics<parallel>], iteration_bounds = array<i64: 1>, scalar_prefetch = 0 : i64, scratch_operands = 0 : i64, tpu.core_type = #tpu.core_type<tc>, window_params = [{transform_indices = @transform_0, window_bounds = array<i64: 4, 128>}, {transform_indices = @transform_1, window_bounds = array<i64: 4, 128>}]} {
    %c0 = arith.constant 0 : index
    %c0_0 = arith.constant 0 : index
    %0 = vector.load %arg1[%c0, %c0_0] : memref<4x128xf32, #tpu.memory_space<vmem>>, vector<4x128xf32>
    %c0_1 = arith.constant 0 : index
    %c0_2 = arith.constant 0 : index
    %1 = vector.load %arg2[%c0_1, %c0_2] : memref<4x128xf32, #tpu.memory_space<vmem>>, vector<4x128xf32>
    tpu.vector_store %arg2[%c0_1, %c0_2], %0 {strides = array<i32>} : memref<4x128xf32, #tpu.memory_space<vmem>>, vector<4x128xf32>,
    return
  }
  func.func @transform_0(%arg0: i32) -> (i32, i32) {
    %c0_i32 = arith.constant 0 : i32
    %c0_i32_0 = arith.constant 0 : i32
    return %arg0, %c0_i32 : i32, i32
  }
  func.func @transform_1(%arg0: i32) -> (i32, i32) {
    %c0_i32 = arith.constant 0 : i32
    %c0_i32_0 = arith.constant 0 : i32
    return %arg0, %c0_i32 : i32, i32
  }
}

</mosaic_0001>

<bundles_post_ra>
// kernel: identity_map.1
= control target key start
LH: loop header
LB: loop body
LE: loop exit
PB: predicated region body
PF: predicated region fallthrough
CT: control target
= control target key end

     0   :  { %s30_s0 = inlined_call_operand.vmem [shape: f32[4,128], index: 0, kind: input, shape index: {}, may-alias: {0,1}]   ;;  %s31_s1 = inlined_call_operand.vmem [shape: f32[4,128], index: 1, kind: output, shape index: {}, may-alias: {0,1}]  }
   0x1   :  { %v8_v0 = vld [vmem:[%s30_s0] sm:$0xf] }
   0x2   :  { %9 = vst [vmem:[%s31_s1] sm:$0xf] %v8_v0 }

</bundles_post_ra>
